<compile_context>
chip_gen: v5e
topology: v5e:2x2
jax: 0.10.0
libtpu: 0.0.40
codegen_flags: <defaults>
</compile_context>

<pallas_src>
import jax
import jax.numpy as jnp
from jax.experimental import pallas as pl
from jax.experimental.pallas import tpu as pltpu


# ----------------------------------------------------------------------------
# Kernel: fused linear head with K-accumulation   out = X @ W + b
# ----------------------------------------------------------------------------
def _linear_kernel(x_ref, w_ref, b_ref, out_ref, acc_ref):
    k = pl.program_id(1)

    @pl.when(k == 0)
    def _():
        acc_ref[...] = jnp.zeros_like(acc_ref)

    acc_ref[...] += jnp.dot(
        x_ref[...].astype(w_ref.dtype), w_ref[...],
        preferred_element_type=jnp.float32)

    @pl.when(k == pl.num_programs(1) - 1)
    def _():
        out_ref[...] = (acc_ref[...] + b_ref[...]).astype(out_ref.dtype)


# ----------------------------------------------------------------------------
# Tiling helpers
# ----------------------------------------------------------------------------
def _round_up(x, k):
    return ((x + k - 1) // k) * k


def _vmem_budget():
    """(tile budget, vmem_limit_bytes) per TPU generation."""
    try:
        cap = int(pltpu.get_tpu_info().vmem_capacity_bytes)
    except Exception:
        cap = 64 * 1024 * 1024                      # conservative (v7x per-TC)
    if cap >= 100 * 1024 * 1024:                    # v5e / v6e: 128 MiB
        return 48 * 1024 * 1024, 64 * 1024 * 1024
    return 36 * 1024 * 1024, 48 * 1024 * 1024       # v7x: 64 MiB per TC


_TB_CANDS = (4096, 2048, 1024, 512, 256, 128, 64, 32, 16)
_TK_CANDS = (2048, 1024, 512, 256, 128)


def _select_tiles(batch, hid, n_pad, x_itemsize, w_itemsize, budget_bytes,
                  max_tb=None, max_tk=None):
    """Pick (tb, tk, n_xbuf) whose padded, double-buffered working set fits."""
    x_sub = 16 if x_itemsize == 2 else 8
    w_sub = 16 if w_itemsize == 2 else 8

    def fits(tb, tk, nbuf):
        tk_lane = _round_up(tk, 128)                       # X lane padding
        x_bytes = nbuf * _round_up(tb, x_sub) * tk_lane * x_itemsize
        w_bytes = 2 * _round_up(tk, w_sub) * n_pad * w_itemsize
        b_bytes = 8 * n_pad * 4
        o_bytes = 2 * _round_up(tb, 8) * n_pad * 4
        a_bytes = _round_up(tb, 8) * n_pad * 4             # f32 accumulator
        return x_bytes + w_bytes + b_bytes + o_bytes + a_bytes <= budget_bytes

    tb_cands = [c for c in _TB_CANDS if max_tb is None or c <= max_tb]
    if not tb_cands:
        tb_cands = [max(8, int(max_tb))]

    def best_tb(tk):
        if (max_tb is None or batch <= max_tb) and fits(batch, tk, 2):
            return batch                                   # one full-batch block
        for c in tb_cands:
            if c <= batch and fits(c, tk, 2):
                return c
        return None

    if max_tk is not None and max_tk < hid:
        tk_opts = [t for t in _TK_CANDS if t <= max_tk and hid % t == 0] or [hid]
    else:
        tk_opts = [hid] + [t for t in _TK_CANDS if t < hid and hid % t == 0]

    choice = None
    for tk in tk_opts:
        tb = best_tb(tk)
        if tb is not None:
            choice = (tb, tk)
            if tb == batch or tb >= 256:
                break
    if choice is None:
        # Pathological hid: fall back to the smallest legal batch tile.
        choice = (batch if batch <= 16 else 16, tk_opts[0])

    tb, tk = choice
    grid_b = -(-batch // tb)
    n_xbuf = 3 if (grid_b >= 4 and fits(tb, tk, 3)) else 2
    return tb, tk, n_xbuf


def _x_block_spec(tb, tk, n_xbuf):
    index_map = lambda i, k: (i, k)
    if n_xbuf > 2:
        try:
            return pl.BlockSpec((tb, tk), index_map,
                                pipeline_mode=pl.Buffered(n_xbuf))
        except Exception:
            pass  # older jax without pipeline_mode -> default double buffering
    return pl.BlockSpec((tb, tk), index_map)


# ----------------------------------------------------------------------------
# Fused linear: returns the lane-padded (batch, n_pad) f32 slab
# ----------------------------------------------------------------------------
def _fused_linear(X, w_cat, b_cat, *, max_tb=None, max_tk=None):
    """X: (batch, hid); w_cat: (hid, n_pad) compute dtype; b_cat: (1, n_pad) f32."""
    batch, hid = X.shape
    n_pad = w_cat.shape[1]

    budget, vmem_limit = _vmem_budget()
    tb, tk, n_xbuf = _select_tiles(
        batch, hid, n_pad,
        x_itemsize=X.dtype.itemsize,
        w_itemsize=w_cat.dtype.itemsize,
        budget_bytes=budget,
        max_tb=max_tb, max_tk=max_tk)

    grid = (pl.cdiv(batch, tb), pl.cdiv(hid, tk))

    cost = pl.CostEstimate(
        flops=2 * batch * hid * n_pad,
        transcendentals=0,
        bytes_accessed=(batch * hid * X.dtype.itemsize
                        + hid * n_pad * w_cat.dtype.itemsize
                        + batch * n_pad * 4),
    )

    out = pl.pallas_call(
        _linear_kernel,
        out_shape=jax.ShapeDtypeStruct((batch, n_pad), jnp.float32),
        grid=grid,
        in_specs=[
            _x_block_spec(tb, tk, n_xbuf),                    # X tiles (pipelined)
            pl.BlockSpec((tk, n_pad), lambda i, k: (k, 0)),   # weights
            pl.BlockSpec((1, n_pad), lambda i, k: (0, 0)),    # bias (resident)
        ],
        out_specs=pl.BlockSpec((tb, n_pad), lambda i, k: (i, 0)),
        scratch_shapes=[pltpu.VMEM((tb, n_pad), jnp.float32)],
        compiler_params=pltpu.CompilerParams(
            dimension_semantics=("parallel", "arbitrary"),
            vmem_limit_bytes=vmem_limit,
        ),
        cost_estimate=cost,
    )(X, w_cat, b_cat)
    return out


# ----------------------------------------------------------------------------
# Wrapper ("module")
# ----------------------------------------------------------------------------
class Regressor:
    """JAX/Pallas port of the PyTorch Regressor module."""

    def __init__(self, loss_function: str, hid: int, m: int, key,
                 compute_dtype=jnp.bfloat16):
        self.loss_function = loss_function
        self.hid = hid
        self.m = m

        def linear_params(k):
            # Mimic nn.Linear default init: U(-1/sqrt(hid), 1/sqrt(hid)).
            kw, kb = jax.random.split(k)
            bound = 1.0 / jnp.sqrt(jnp.float32(hid))
            w = jax.random.uniform(kw, (m, hid), jnp.float32, -bound, bound)
            b = jax.random.uniform(kb, (m,), jnp.float32, -bound, bound)
            return w, b

        if loss_function in ("MSE", "L1"):
            self.mean_w, self.mean_b = linear_params(key)
            heads = [(self.mean_w, self.mean_b)]
        elif loss_function == "Gaussian":
            k1, k2 = jax.random.split(key)
            self.mean_w, self.mean_b = linear_params(k1)
            self.var_w, self.var_b = linear_params(k2)
            heads = [(self.mean_w, self.mean_b), (self.var_w, self.var_b)]
        else:
            raise ValueError(f"unsupported loss_function: {loss_function}")

        # Pack once at init: transpose, concat heads, lane-pad to 128, cast.
        n_out = len(heads) * m
        n_pad = _round_up(max(n_out, 1), 128)
        w_cat = jnp.concatenate([w.T for (w, _) in heads], axis=1)   # (hid, n_out)
        b_cat = jnp.concatenate([b for (_, b) in heads], axis=0)     # (n_out,)
        if n_pad != n_out:
            w_cat = jnp.pad(w_cat, ((0, 0), (0, n_pad - n_out)))
            b_cat = jnp.pad(b_cat, ((0, n_pad - n_out),))
        self._w_cat = jnp.asarray(w_cat, compute_dtype)              # (hid, n_pad)
        self._b_cat = jnp.asarray(b_cat, jnp.float32).reshape(1, n_pad)
        self._n_out = n_out

    def __call__(self, X, *, max_tb=None, max_tk=None):
        m = self.m
        # No dtype upcast of X: stream it as given (bf16 halves HBM traffic).
        out = _fused_linear(X, self._w_cat, self._b_cat,
                            max_tb=max_tb, max_tk=max_tk)
        if self.loss_function in ("MSE", "L1"):
            return [out[:, :m]]
        # Gaussian: slice both heads directly from the single padded slab.
        return [out[:, :m], out[:, m:2 * m]]


# ----------------------------------------------------------------------------
# Demo / correctness check
# ----------------------------------------------------------------------------
if __name__ == "__main__":
    key = jax.random.PRNGKey(0)
    k_x, k_mse, k_gauss, k_f32, k_big = jax.random.split(key, 5)

    batch, hid, m = 8, 32, 4
    X = jax.random.normal(k_x, (batch, hid), jnp.float32)

    def ref_linear(Xr, w, b, dtype):
        Xq = Xr.astype(dtype).astype(jnp.float32)
        Wq = w.astype(dtype).astype(jnp.float32)
        return Xq @ Wq.T + b

    # --- MSE / L1 mode, default bf16 compute ---
    reg_mse = Regressor("MSE", hid, m, k_mse)
    (mean_mse,) = reg_mse(X)
    jax.block_until_ready(mean_mse)
    ref = ref_linear(X, reg_mse.mean_w, reg_mse.mean_b, jnp.bfloat16)
    assert mean_mse.shape == (batch, m)
    assert jnp.allclose(mean_mse, ref, atol=1e-3, rtol=1e-3), "MSE head mismatch"

    # --- Gaussian mode (fused mean + var heads), bf16 compute ---
    reg_g = Regressor("Gaussian", hid, m, k_gauss)
    mean_g, var_g = reg_g(X)
    jax.block_until_ready(mean_g)
    jax.block_until_ready(var_g)
    assert mean_g.shape == (batch, m) and var_g.shape == (batch, m)
    assert jnp.allclose(mean_g, ref_linear(X, reg_g.mean_w, reg_g.mean_b, jnp.bfloat16),
                        atol=1e-3, rtol=1e-3), "Gaussian mean mismatch"
    assert jnp.allclose(var_g, ref_linear(X, reg_g.var_w, reg_g.var_b, jnp.bfloat16),
                        atol=1e-3, rtol=1e-3), "Gaussian var mismatch"

    # --- f32 compute path reproduces original-module numerics exactly ---
    reg_f32 = Regressor("L1", hid, m, k_f32, compute_dtype=jnp.float32)
    (mean_f32,) = reg_f32(X)
    jax.block_until_ready(mean_f32)
    assert jnp.allclose(mean_f32, X @ reg_f32.mean_w.T + reg_f32.mean_b,
                        atol=1e-5), "f32 path mismatch"

    # --- Forced small tiles: exercises the multi-step batch pipeline
    #     (Buffered X), the K-accumulator path and bf16 X streaming ---
    hid2, batch2 = 256, 64
    X2 = jax.random.normal(k_x, (batch2, hid2), jnp.float32).astype(jnp.bfloat16)
    reg_big = Regressor("Gaussian", hid2, m, k_big)
    mean_k, var_k = reg_big(X2, max_tb=16, max_tk=128)
    jax.block_until_ready(mean_k)
    jax.block_until_ready(var_k)
    assert jnp.allclose(mean_k, ref_linear(X2, reg_big.mean_w, reg_big.mean_b, jnp.bfloat16),
                        atol=2e-3, rtol=2e-3), "tiled Gaussian mean mismatch"
    assert jnp.allclose(var_k, ref_linear(X2, reg_big.var_w, reg_big.var_b, jnp.bfloat16),
                        atol=2e-3, rtol=2e-3), "tiled Gaussian var mismatch"

    print("KERNEL_OK")
</pallas_src>

<mosaic_0001>
module attributes {stable_mosaic.version = 11 : i64} {
  func.func @_linear_kernel(%arg0: i32, %arg1: i32, %arg2: memref<8x32xf32, #tpu.memory_space<vmem>>, %arg3: memref<32x128xbf16, #tpu.memory_space<vmem>>, %arg4: memref<1x128xf32, #tpu.memory_space<vmem>>, %arg5: memref<8x128xf32, #tpu.memory_space<vmem>>, %arg6: memref<8x128xf32, #tpu.memory_space<vmem>>) attributes {dimension_semantics = [#tpu.dimension_semantics<parallel>, #tpu.dimension_semantics<arbitrary>], iteration_bounds = array<i64: 1, 1>, scalar_prefetch = 0 : i64, scratch_operands = 1 : i64, tpu.core_type = #tpu.core_type<tc>, window_params = [{transform_indices = @transform_0, window_bounds = array<i64: 8, 32>}, {transform_indices = @transform_1, window_bounds = array<i64: 32, 128>}, {pipeline_mode = #tpu.pipeline_mode<synchronous>, transform_indices = @transform_2, window_bounds = array<i64: 1, 128>}, {transform_indices = @transform_3, window_bounds = array<i64: 8, 128>}]} {
    %c0_i32 = arith.constant 0 : i32
    %0 = arith.cmpi eq, %arg1, %c0_i32 : i32
    %1 = arith.extui %0 : i1 to i32
    %c0_i32_0 = arith.constant 0 : i32
    %2 = arith.cmpi ne, %1, %c0_i32_0 : i32
    scf.if %2 {
      %cst_10 = arith.constant 0.000000e+00 : f32
      %13 = vector.broadcast %cst_10 : f32 to vector<8x128xf32>
      %c0_11 = arith.constant 0 : index
      %c0_12 = arith.constant 0 : index
      %14 = vector.load %arg6[%c0_11, %c0_12] : memref<8x128xf32, #tpu.memory_space<vmem>>, vector<8x128xf32>
      tpu.vector_store %arg6[%c0_11, %c0_12], %13 {strides = array<i32>} : memref<8x128xf32, #tpu.memory_space<vmem>>, vector<8x128xf32>,
    } else {
    }
    %c0 = arith.constant 0 : index
    %c0_1 = arith.constant 0 : index
    %3 = vector.load %arg6[%c0, %c0_1] : memref<8x128xf32, #tpu.memory_space<vmem>>, vector<8x128xf32>
    %c0_2 = arith.constant 0 : index
    %c0_3 = arith.constant 0 : index
    %4 = vector.load %arg2[%c0_2, %c0_3] : memref<8x32xf32, #tpu.memory_space<vmem>>, vector<8x32xf32>
    %5 = arith.truncf %4 : vector<8x32xf32> to vector<8x32xbf16>
    %c0_4 = arith.constant 0 : index
    %c0_5 = arith.constant 0 : index
    %6 = vector.load %arg3[%c0_4, %c0_5] : memref<32x128xbf16, #tpu.memory_space<vmem>>, vector<32x128xbf16>
    %cst = arith.constant dense<0.000000e+00> : vector<8x128xf32>
    %7 = tpu.matmul %5, %6, %cst {dimension_numbers = #tpu.dot_dimension_numbers<[1], [0], [0], [1], [0, 0, 1, 1], [], []>} : vector<8x32xbf16>, vector<32x128xbf16>, vector<8x128xf32> -> vector<8x128xf32>
    %8 = arith.addf %3, %7 : vector<8x128xf32>
    %c0_6 = arith.constant 0 : index
    %c0_7 = arith.constant 0 : index
    %9 = vector.load %arg6[%c0_6, %c0_7] : memref<8x128xf32, #tpu.memory_space<vmem>>, vector<8x128xf32>
    tpu.vector_store %arg6[%c0_6, %c0_7], %8 {strides = array<i32>} : memref<8x128xf32, #tpu.memory_space<vmem>>, vector<8x128xf32>,
    %c0_i32_8 = arith.constant 0 : i32
    %10 = arith.cmpi eq, %arg1, %c0_i32_8 : i32
    %11 = arith.extui %10 : i1 to i32
    %c0_i32_9 = arith.constant 0 : i32
    %12 = arith.cmpi ne, %11, %c0_i32_9 : i32
    scf.if %12 {
      %c0_10 = arith.constant 0 : index
      %c0_11 = arith.constant 0 : index
      %13 = vector.load %arg6[%c0_10, %c0_11] : memref<8x128xf32, #tpu.memory_space<vmem>>, vector<8x128xf32>
      %c0_12 = arith.constant 0 : index
      %c0_13 = arith.constant 0 : index
      %14 = vector.load %arg4[%c0_12, %c0_13] : memref<1x128xf32, #tpu.memory_space<vmem>>, vector<1x128xf32>
      %15 = vector.broadcast %14 : vector<1x128xf32> to vector<8x128xf32>
      %16 = arith.addf %13, %15 : vector<8x128xf32>
      %c0_14 = arith.constant 0 : index
      %c0_15 = arith.constant 0 : index
      %17 = vector.load %arg5[%c0_14, %c0_15] : memref<8x128xf32, #tpu.memory_space<vmem>>, vector<8x128xf32>
      tpu.vector_store %arg5[%c0_14, %c0_15], %16 {strides = array<i32>} : memref<8x128xf32, #tpu.memory_space<vmem>>, vector<8x128xf32>,
    } else {
    }
    return
  }
  func.func @transform_0(%arg0: i32, %arg1: i32) -> (i32, i32) {
    %c0_i32 = arith.constant 0 : i32
    return %arg0, %arg1 : i32, i32
  }
  func.func @transform_1(%arg0: i32, %arg1: i32) -> (i32, i32) {
    %c0_i32 = arith.constant 0 : i32
    %c0_i32_0 = arith.constant 0 : i32
    return %arg1, %c0_i32 : i32, i32
  }
  func.func @transform_2(%arg0: i32, %arg1: i32) -> (i32, i32) {
    %c0_i32 = arith.constant 0 : i32
    %c0_i32_0 = arith.constant 0 : i32
    %c0_i32_1 = arith.constant 0 : i32
    return %c0_i32, %c0_i32_0 : i32, i32
  }
  func.func @transform_3(%arg0: i32, %arg1: i32) -> (i32, i32) {
    %c0_i32 = arith.constant 0 : i32
    %c0_i32_0 = arith.constant 0 : i32
    return %arg0, %c0_i32 : i32, i32
  }
}

</mosaic_0001>

<bundles_post_ra>
// kernel: tpu_custom_call.1
= control target key start
LH: loop header
LB: loop body
LE: loop exit
PB: predicated region body
PF: predicated region fallthrough
CT: control target
= control target key end

     0   :  { %8 = vsyncpa [#allocation4], 0  ;;  %s249_s0 = inlined_call_operand.hbm [shape: f32[8,32], index: 0, kind: input, shape index: {}]   ;;  %s250_s1 = inlined_call_operand.hbm [shape: bf16[32,128], index: 1, kind: input, shape index: {}]   ;;  %s251_s2 = inlined_call_operand.vmem [shape: f32[1,128], index: 2, kind: input, shape index: {}]   ;;  %s252_s3 = inlined_call_operand.hbm [shape: f32[8,128], index: 3, kind: output, shape index: {}]  }
   0x1   :  { %9 = vsyncpa [#allocation7], 0 }
   0x2   :  { %10 = vsyncpa [#allocation5], 0  ;;  %s16_s14 = sshll.u32 %s249_s0, 4  ;;  %s212_s15 = smov [#allocation3]   ;;  %s17_s14 = int_to_ptr.hbm [resolvable:$true] %s16_s14 }
   0x3   :  { %s18_s16 = sshll.u32 %s212_s15, 4  ;;  %s26_s19 = sshll.u32 %s250_s1, 4  ;;  %s19_s16 = int_to_ptr.vmem [resolvable:$true] %s18_s16  ;;  %s27_s19 = int_to_ptr.hbm [resolvable:$true] %s26_s19 }
   0x4   :  { %21 = dma.hbm_to_vmem [thread:$0]  %s17_s14, 128, %s19_s16, [#allocation4]  }
   0x5   :  { %s213_s20 = smov [#allocation6]   ;;  %s214_s22 = smov 64  }
   0x6   :  { %s28_s21 = sshll.u32 %s213_s20, 4  ;;  %s215_s23 = smov 4   ;;  %s29_s21 = int_to_ptr.vmem [resolvable:$true] %s28_s21 }
   0x7   :  { %34 = dma.hbm_to_vmem [thread:$0]  %s27_s19, 256, %s29_s21, [#allocation7], %s214_s22, %s214_s22, %s215_s23  }
   0x8   :  { %206 = dma.done.wait [#allocation4], 128  }
   0x9   :  { %207 = vsyncadd [#allocation4], 4294967168 }
   0xa   :  { %208 = dma.done.wait [#allocation7], 256  }
   0xb   :  { %209 = vsyncadd [#allocation7], 4294967040  ;;  %v127_v0 = vld [vmem:[#allocation6 + $0x8] sm:$0xff]  ;;  %v126_v1 = vld [vmem:[#allocation6] sm:$0xff]  ;;  %vm70_vm0 = vcmask 261120   ;;  %s216_s24 = smov [#allocation8]  }
   0xc   :  { %80 = vmatpush.bf16.msra.mxu0 %v127_v0  ;;  %v52_v2 = vld [vmem:[#allocation3] sm:$0xff]  ;;  %s104_s25 = sshll.u32 %s216_s24, 4  ;;  %s106_s28 = sshll.u32 %s252_s3, 4  ;;  %s105_s25 = int_to_ptr.vmem [resolvable:$true] %s104_s25  ;;  %s107_s28 = int_to_ptr.hbm [resolvable:$true] %s106_s28 }
   0xd   :  { %v53_v3 = vpack.c.bf16 %v52_v2, %v52_v2  ;;  %v133_v4 = vld [vmem:[%s251_s2] ss:$0 sm:$0xff] }
  0x10   :  { %81 = vmatpush.bf16.msra.mxu0 %v126_v1 }
  0x13   :  { %125 = vmatmul.msk.bf16.vlgmr.msra.gmra.mxu0 %vm70_vm0, %v53_v3 }
  0x90   :  { %v83_v5 = vpop.f32.mrf.mxu0 }
  0x91   :  { %v97_v6 = vadd.f32 %v133_v4, %v83_v5 }
  0x93   :  { %98 = vst [vmem:[#allocation8] sm:$0xff] %v97_v6 }
  0x94   :  { %109 = dma.vmem_to_hbm [thread:$0]  %s105_s25, 128, %s107_s28, [#allocation5]  }
  0x98   :  { %v85_v7 = vpop.f32.mrf.mxu0 }
  0x99   :  { %210 = dma.done.wait [#allocation5], 128  }
  0x9a   :  { %211 = vsyncadd [#allocation5], 4294967168 }
  0x9b   :  { %114 = vsyncpa [#allocation4], 1 }
  0x9c   :  { %115 = vsyncpa [#allocation7], 1 }
  0x9d   :  { %116 = vsyncpa [#allocation5], 1 }

</bundles_post_ra>
